<compile_context>
chip_gen: v5e
topology: v5e:2x2
jax: 0.10.0
libtpu: 0.0.40
codegen_flags: <defaults>
</compile_context>

<pallas_src>
import functools

import jax
import jax.numpy as jnp
from jax.experimental import pallas as pl
from jax.experimental.pallas import tpu as pltpu

ALPHA = 1.5
GAMMA = 2.0
NUM_CLASSES = 6

assert GAMMA == 2.0, "kernel hard-codes the gamma==2 square; generalize before changing GAMMA"

_LANE = 128
_MIN_TILE_N = 2048         # amortize the ~0.35 us per-grid-step overhead
_MAX_TILE_N = 32768        # 6 * 32768 * 4B = 768 KiB per logits buffer
_TARGET_GRID_STEPS = 4     # >= 2 so v7x's two TensorCores both get work


def _cdiv(a, b):
    return -(-a // b)


def _round_up(x, m):
    return _cdiv(x, m) * m


def _pick_tile_n(n):
    tile = _round_up(_cdiv(n, _TARGET_GRID_STEPS), _LANE)
    tile = max(_MIN_TILE_N, min(_MAX_TILE_N, tile))
    # Never larger than the lane-rounded batch itself (small-batch corner).
    return min(tile, _round_up(n, _LANE))


def _focal_loss_kernel(logits_ref, targets_ref, out_ref, *, n_valid):
    # logits_ref: (C, T) float ; targets_ref: (1, T) int32 ; out_ref: (1, 128)
    c, tile_n = logits_ref.shape
    tile_start = pl.program_id(0) * tile_n

    # Tail mask for the (possibly partial) last tile: lane column is valid iff
    # its global batch index is < n_valid.
    lane = jax.lax.broadcasted_iota(jnp.int32, (1, tile_n), 1)
    valid = (tile_start + lane) < n_valid                                # (1, T) bool

    # Zero out-of-bounds garbage before any math so NaN/Inf cannot propagate.
    logits = jnp.where(valid, logits_ref[...].astype(jnp.float32), 0.0)  # (C, T)
    tgt = targets_ref[...]                                               # (1, T)

    # Numerically-stable softmax pieces; class reduction over the small,
    # static sublane axis (C = 6).
    m = jnp.max(logits, axis=0, keepdims=True)                           # (1, T)
    shifted = logits - m                                                 # (C, T)
    e = jnp.exp(shifted)                                                 # one EUP pass over (C, T)
    sumexp = jnp.sum(e, axis=0, keepdims=True)                           # (1, T)

    # Target gather via one-hot select (no dynamic gather on TPU).
    class_ids = jax.lax.broadcasted_iota(jnp.int32, (c, tile_n), 0)      # (C, T)
    tgt_shift = jnp.sum(jnp.where(class_ids == tgt, shifted, 0.0),
                        axis=0, keepdims=True)                           # tgt_logit - m

    # Cross-entropy and target probability:
    #   ce = log(sumexp) - (tgt_logit - m)
    #   pt = exp(-ce)            (single (1,T) EUP op; matches the reference)
    ce = jnp.log(sumexp) - tgt_shift                                     # (1, T)
    pt = jnp.exp(-ce)                                                    # (1, T)

    u = 1.0 - pt
    focal = ALPHA * (u * u) * ce                                         # gamma == 2 -> square
    focal = jnp.where(valid, focal, 0.0)                                 # mask tail padding

    # Per-tile partial sum -> single lane-dense 128-wide (unmasked) store,
    # with the sum parked in lane 0 and zeros elsewhere.
    partial = jnp.sum(focal)
    out_lane = jax.lax.broadcasted_iota(jnp.int32, (1, _LANE), 1)
    out_ref[...] = jnp.where(out_lane == 0, partial, 0.0)


@functools.partial(jax.jit, static_argnames=("tile_n",))
def focal_loss(logits, targets, tile_n=None):
    """logits: (N, C) float; targets: (N,) int class ids. Returns scalar mean focal loss."""
    n, c = logits.shape

    if tile_n is None:
        tile_n = _pick_tile_n(n)
    assert tile_n % _LANE == 0

    # Lane-dense layout: classes on sublanes, batch on lanes.
    # TODO(synk): ideally the producer emits logits already as (C, N) so this
    # transpose (one extra HBM round-trip of the logits) disappears entirely.
    logits_t = jnp.transpose(logits)                          # (C, N)
    targets_2d = targets.astype(jnp.int32).reshape(1, n)      # (1, N)

    num_tiles = _cdiv(n, tile_n)
    grid = (num_tiles,)

    partial_sums = pl.pallas_call(
        functools.partial(_focal_loss_kernel, n_valid=n),
        out_shape=jax.ShapeDtypeStruct((1, num_tiles * _LANE), jnp.float32),
        grid=grid,
        in_specs=[
            pl.BlockSpec((c, tile_n), lambda i: (0, i)),
            pl.BlockSpec((1, tile_n), lambda i: (0, i)),
        ],
        out_specs=pl.BlockSpec((1, _LANE), lambda i: (0, i)),
        compiler_params=pltpu.CompilerParams(
            dimension_semantics=("parallel",)),
    )(logits_t, targets_2d)

    # Tiny final reduction over grid*128 floats (only lane 0 of each tile is
    # non-zero); divide by the true batch size.
    return jnp.sum(partial_sums) / n


def _focal_loss_ref(logits, targets):
    """Pure-JAX reference mirroring the PyTorch forward."""
    logp = jax.nn.log_softmax(logits.astype(jnp.float32), axis=-1)
    ce = -jnp.take_along_axis(logp, targets[:, None].astype(jnp.int32), axis=-1)[:, 0]
    pt = jnp.exp(-ce)
    return jnp.mean(ALPHA * (1.0 - pt) ** GAMMA * ce)


if __name__ == "__main__":
    key = jax.random.PRNGKey(0)
    k1, k2, k3, k4 = jax.random.split(key, 4)

    # Small shape matching the module: batch of 8 samples, 6 classes.
    N = 8
    logits = jax.random.normal(k1, (N, NUM_CLASSES), dtype=jnp.float32)
    targets = jax.random.randint(k2, (N,), 0, NUM_CLASSES, dtype=jnp.int32)

    loss = jax.block_until_ready(focal_loss(logits, targets))
    ref = _focal_loss_ref(logits, targets)
    assert jnp.allclose(loss, ref, rtol=1e-5, atol=1e-5), (loss, ref)

    # Multi-tile path: non-multiple-of-128 batch, grid > 1, in-kernel tail mask.
    N2 = 300
    logits2 = jax.random.normal(k3, (N2, NUM_CLASSES), dtype=jnp.float32)
    targets2 = jax.random.randint(k4, (N2,), 0, NUM_CLASSES, dtype=jnp.int32)
    loss2 = jax.block_until_ready(focal_loss(logits2, targets2, tile_n=128))
    ref2 = _focal_loss_ref(logits2, targets2)
    assert jnp.allclose(loss2, ref2, rtol=1e-5, atol=1e-5), (loss2, ref2)

    # Default tile selection on the same batch (single partial block).
    loss3 = jax.block_until_ready(focal_loss(logits2, targets2))
    assert jnp.allclose(loss3, ref2, rtol=1e-5, atol=1e-5), (loss3, ref2)

    print("KERNEL_OK")
</pallas_src>

<mosaic_0001>
module attributes {stable_mosaic.version = 11 : i64} {
  func.func @_focal_loss_kernel(%arg0: i32, %arg1: memref<6x128xf32, #tpu.memory_space<vmem>>, %arg2: memref<1x128xi32, #tpu.memory_space<vmem>>, %arg3: memref<1x128xf32, #tpu.memory_space<vmem>>) attributes {dimension_semantics = [#tpu.dimension_semantics<parallel>], iteration_bounds = array<i64: 1>, scalar_prefetch = 0 : i64, scratch_operands = 0 : i64, tpu.core_type = #tpu.core_type<tc>, window_params = [{transform_indices = @transform_0, window_bounds = array<i64: 6, 128>}, {transform_indices = @transform_1, window_bounds = array<i64: 1, 128>}, {transform_indices = @transform_2, window_bounds = array<i64: 1, 128>}]} {
    %c128_i32 = arith.constant 128 : i32
    %0 = arith.muli %arg0, %c128_i32 : i32
    %1 = tpu.iota {dimensions = array<i32: 1>} : vector<1x128xi32>
    %2 = vector.broadcast %0 : i32 to vector<1x128xi32>
    %3 = arith.addi %2, %1 : vector<1x128xi32>
    %c8_i32 = arith.constant 8 : i32
    %4 = vector.broadcast %c8_i32 : i32 to vector<1x128xi32>
    %5 = arith.cmpi slt, %3, %4 : vector<1x128xi32>
    %c0 = arith.constant 0 : index
    %c0_0 = arith.constant 0 : index
    %6 = vector.load %arg1[%c0, %c0_0] : memref<6x128xf32, #tpu.memory_space<vmem>>, vector<6x128xf32>
    %cst = arith.constant 0.000000e+00 : f32
    %7 = vector.shape_cast %5 : vector<1x128xi1> to vector<1x128xi1>
    %8 = vector.broadcast %7 : vector<1x128xi1> to vector<6x128xi1>
    %9 = vector.broadcast %cst : f32 to vector<6x128xf32>
    %10 = arith.select %8, %6, %9 : vector<6x128xi1>, vector<6x128xf32>
    %c0_1 = arith.constant 0 : index
    %c0_2 = arith.constant 0 : index
    %11 = vector.load %arg2[%c0_1, %c0_2] : memref<1x128xi32, #tpu.memory_space<vmem>>, vector<1x128xi32>
    %cst_3 = arith.constant dense<0xFF800000> : vector<128xf32>
    %12 = vector.multi_reduction <maximumf>, %10, %cst_3 [0] : vector<6x128xf32> to vector<128xf32>
    %13 = vector.shape_cast %12 : vector<128xf32> to vector<1x128xf32>
    %14 = vector.broadcast %13 : vector<1x128xf32> to vector<6x128xf32>
    %15 = arith.subf %10, %14 : vector<6x128xf32>
    %16 = math.exp %15 : vector<6x128xf32>
    %cst_4 = arith.constant dense<0.000000e+00> : vector<128xf32>
    %17 = vector.multi_reduction <add>, %16, %cst_4 [0] : vector<6x128xf32> to vector<128xf32>
    %18 = vector.shape_cast %17 : vector<128xf32> to vector<1x128xf32>
    %19 = tpu.iota {dimensions = array<i32: 0>} : vector<6x128xi32>
    %20 = vector.broadcast %11 : vector<1x128xi32> to vector<6x128xi32>
    %21 = arith.cmpi eq, %19, %20 : vector<6x128xi32>
    %cst_5 = arith.constant 0.000000e+00 : f32
    %22 = vector.broadcast %cst_5 : f32 to vector<6x128xf32>
    %23 = arith.select %21, %15, %22 : vector<6x128xi1>, vector<6x128xf32>
    %cst_6 = arith.constant dense<0.000000e+00> : vector<128xf32>
    %24 = vector.multi_reduction <add>, %23, %cst_6 [0] : vector<6x128xf32> to vector<128xf32>
    %25 = vector.shape_cast %24 : vector<128xf32> to vector<1x128xf32>
    %26 = math.log %18 : vector<1x128xf32>
    %27 = arith.subf %26, %25 : vector<1x128xf32>
    %cst_7 = arith.constant 0.000000e+00 : f32
    %28 = vector.broadcast %cst_7 : f32 to vector<1x128xf32>
    %29 = arith.subf %28, %27 : vector<1x128xf32>
    %30 = math.exp %29 : vector<1x128xf32>
    %cst_8 = arith.constant 1.000000e+00 : f32
    %31 = vector.broadcast %cst_8 : f32 to vector<1x128xf32>
    %32 = arith.subf %31, %30 : vector<1x128xf32>
    %33 = arith.mulf %32, %32 : vector<1x128xf32>
    %cst_9 = arith.constant 1.500000e+00 : f32
    %34 = vector.broadcast %cst_9 : f32 to vector<1x128xf32>
    %35 = arith.mulf %34, %33 : vector<1x128xf32>
    %36 = arith.mulf %35, %27 : vector<1x128xf32>
    %cst_10 = arith.constant 0.000000e+00 : f32
    %37 = vector.broadcast %cst_10 : f32 to vector<1x128xf32>
    %38 = arith.select %5, %36, %37 : vector<1x128xi1>, vector<1x128xf32>
    %39 = vector.shape_cast %38 : vector<1x128xf32> to vector<1x1x128xf32>
    %cst_11 = arith.constant dense<0.000000e+00> : vector<1xf32>
    %40 = vector.multi_reduction <add>, %39, %cst_11 [1, 2] : vector<1x1x128xf32> to vector<1xf32>
    %41 = vector.shape_cast %40 : vector<1xf32> to vector<1x1x1xf32>
    %42 = vector.extract %41[0, 0, 0] : f32 from vector<1x1x1xf32>
    %43 = tpu.iota {dimensions = array<i32: 1>} : vector<1x128xi32>
    %c0_i32 = arith.constant 0 : i32
    %44 = vector.broadcast %c0_i32 : i32 to vector<1x128xi32>
    %45 = arith.cmpi eq, %43, %44 : vector<1x128xi32>
    %cst_12 = arith.constant 0.000000e+00 : f32
    %46 = vector.broadcast %42 : f32 to vector<1x128xf32>
    %47 = vector.broadcast %cst_12 : f32 to vector<1x128xf32>
    %48 = arith.select %45, %46, %47 : vector<1x128xi1>, vector<1x128xf32>
    %c0_13 = arith.constant 0 : index
    %c0_14 = arith.constant 0 : index
    %49 = vector.load %arg3[%c0_13, %c0_14] : memref<1x128xf32, #tpu.memory_space<vmem>>, vector<1x128xf32>
    tpu.vector_store %arg3[%c0_13, %c0_14], %48 {strides = array<i32>} : memref<1x128xf32, #tpu.memory_space<vmem>>, vector<1x128xf32>,
    return
  }
  func.func @transform_0(%arg0: i32) -> (i32, i32) {
    %c0_i32 = arith.constant 0 : i32
    %c0_i32_0 = arith.constant 0 : i32
    return %c0_i32, %arg0 : i32, i32
  }
  func.func @transform_1(%arg0: i32) -> (i32, i32) {
    %c0_i32 = arith.constant 0 : i32
    %c0_i32_0 = arith.constant 0 : i32
    return %c0_i32, %arg0 : i32, i32
  }
  func.func @transform_2(%arg0: i32) -> (i32, i32) {
    %c0_i32 = arith.constant 0 : i32
    %c0_i32_0 = arith.constant 0 : i32
    return %c0_i32, %arg0 : i32, i32
  }
}

</mosaic_0001>

<bundles_post_ra>
// kernel: focal_loss.1
= control target key start
LH: loop header
LB: loop body
LE: loop exit
PB: predicated region body
PF: predicated region fallthrough
CT: control target
= control target key end

     0   :  { %v12_v0 = vlaneseq  ;;  %vm22_vm0 = vcmask 1045504   ;;  %vm63_vm3 = vcmask 1040384   ;;  %s126_s0 = inlined_call_operand.vmem [shape: f32[6,8], index: 0, kind: input, shape index: {}]   ;;  %s127_s1 = inlined_call_operand.vmem [shape: s32[1,8], index: 1, kind: input, shape index: {}]   ;;  %s128_s2 = inlined_call_operand.vmem [shape: f32[1,128], index: 2, kind: output, shape index: {}]  }
   0x1   :  { %v17_v2 = vld [vmem:[%s126_s0] sm:$0x3f] }
   0x2   :  { %v106_v1 = vand.u32 127, %v12_v0  ;;  %v41_v10 = vshrl.u32 %v12_v0, 7  ;;  %v84_v11 = vld [vmem:[%s127_s1] ss:$0 sm:$0xff] }
   0x4   :  { %vm16_vm1 = vcmp.lt.s32.totalorder %v106_v1, 8  ;;  %vm43_vm2 = vcmp.eq.s32.totalorder %v41_v10, %v84_v11  ;;  %vm74_vm4 = vcmp.eq.s32.totalorder %v106_v1, 0 }
   0x5   :  { %v20_v3 = vsel %vm16_vm1, %v17_v2, 0.0 }
   0x6   :  { %v23_v4 = vsel %vm22_vm0, %v20_v3, -inf }
   0x7   :  { %v24_v5 = vrot.slane %v23_v4, 4 }
   0x9   :  { %v25_v6 = vmax.f32 %v23_v4, %v24_v5 }
   0xb   :  { %v26_v7 = vrot.slane %v25_v6, 2 }
   0xd   :  { %v27_v8 = vmax.f32 %v25_v6, %v26_v7 }
   0xf   :  { %v28_v9 = vrot.slane %v27_v8, 1 }
  0x11   :  { %v29_v12 = vmax.f32 %v27_v8, %v28_v9 }
  0x13   :  { %v30_v13 = vsub.f32 %v20_v3, %v29_v12 }
  0x15   :  { %v31_v14 = vmul.f32 1.442695, %v30_v13  ;;  %v44_v15 = vsel %vm43_vm2, %v30_v13, 0.0 }
  0x16   :  { %v45_v16 = vsel %vm22_vm0, %v44_v15, 0.0 }
  0x17   :  { %85 = vpow2.f32 %v31_v14  ;;  %v46_v17 = vrot.slane %v45_v16, 4 }
  0x19   :  { %v47_v21 = vadd.f32 %v46_v17, %v45_v16 }
  0x1b   :  { %v48_v24 = vrot.slane %v47_v21, 2 }
  0x1d   :  { %v86_v18 = vpop.eup %85  ;;  %v49_v27 = vadd.f32 %v48_v24, %v47_v21 }
  0x1e   :  { %v33_v19 = vsel %vm22_vm0, %v86_v18, 0.0 }
  0x1f   :  { %v34_v20 = vrot.slane %v33_v19, 4  ;;  %v50_v29 = vrot.slane %v49_v27, 1 }
  0x21   :  { %v35_v22 = vadd.f32 %v34_v20, %v33_v19  ;;  %v51_v30 = vadd.f32 %v50_v29, %v49_v27 }
  0x23   :  { %v36_v23 = vrot.slane %v35_v22, 2 }
  0x25   :  { %v37_v25 = vadd.f32 %v36_v23, %v35_v22 }
  0x27   :  { %v38_v26 = vrot.slane %v37_v25, 1 }
  0x29   :  { %v39_v28 = vadd.f32 %v38_v26, %v37_v25 }
  0x2b   :  { %87 = vlog2.f32 %v39_v28 }
  0x31   :  { %v88_v31 = vpop.eup %87 }
  0x32   :  { %v53_v32 = vmul.f32 0.6931472, %v88_v31 }
  0x34   :  { %v54_v33 = vsub.f32 %v53_v32, %v51_v30 }
  0x36   :  { %v55_v34 = vsub.f32 0.0, %v54_v33 }
  0x38   :  { %v56_v35 = vmul.f32 1.442695, %v55_v34 }
  0x3a   :  { %89 = vpow2.f32 %v56_v35 }
  0x40   :  { %v90_v36 = vpop.eup %89 }
  0x41   :  { %v58_v37 = vsub.f32 1.0, %v90_v36 }
  0x43   :  { %v59_v38 = vmul.f32 %v58_v37, %v58_v37 }
  0x45   :  { %v60_v39 = vmul.f32 1.5, %v59_v38 }
  0x47   :  { %v61_v40 = vmul.f32 %v60_v39, %v54_v33 }
  0x49   :  { %v62_v41 = vsel %vm16_vm1, %v61_v40, 0.0 }
  0x4a   :  { %v64_v42 = vsel %vm63_vm3, %v62_v41, 0.0 }
  0x4b   :  { %65 = vadd.xlane.f32.xlu0 %v64_v42 }
  0xbe   :  { %v66_v43 = vpop.xlane.xlu0 %65 }
  0xbf   :  { %v67_v44 = vrot.slane %v66_v43, 4 }
  0xc1   :  { %v68_v45 = vadd.f32 %v67_v44, %v66_v43 }
  0xc3   :  { %v69_v46 = vrot.slane %v68_v45, 2 }
  0xc5   :  { %v70_v47 = vadd.f32 %v69_v46, %v68_v45 }
  0xc7   :  { %v71_v48 = vrot.slane %v70_v47, 1 }
  0xc9   :  { %v72_v49 = vadd.f32 %v71_v48, %v70_v47 }
  0xcb   :  { %82 = vpush %v72_v49 }
  0xfc   :  { %s83_s0 = spop %82 }
  0xfd   :  { %v75_v50 = vstv %s83_s0 }
  0xfe   :  { %v76_v51 = vsel %vm74_vm4, %v75_v50, 0.0 }
  0xff   :  { %77 = vst [vmem:[%s128_s2] sm:$0x1] %v76_v51 }

</bundles_post_ra>
